<compile_context>
chip_gen: v7x
topology: tpu7x:2x2x1
jax: 0.10.0
libtpu: 0.0.40
codegen_flags: <defaults>
</compile_context>

<pallas_src>
import functools

import jax
import jax.numpy as jnp
from jax.experimental import pallas as pl
from jax.experimental.pallas import tpu as pltpu

EPS = 1e-5


def bn_add_kernel(x_ref, skip_ref, gamma_ref, beta_ref, o_ref, *, inv_count):
    # x_ref / skip_ref: (N, ct, L) f32 blocks; gamma_ref / beta_ref: (1, ct, 1)
    x = x_ref[...]

    # Single-pass per-channel batch statistics over (N, L).
    s = jnp.sum(x, axis=(0, 2), keepdims=True)         # (1, ct, 1)
    ss = jnp.sum(x * x, axis=(0, 2), keepdims=True)    # (1, ct, 1)
    mean = s * inv_count
    var = ss * inv_count - mean * mean                 # biased var (PyTorch norm)
    inv = jax.lax.rsqrt(var + EPS)

    # Fold gamma / beta / mean into per-channel scale & bias.
    scale = gamma_ref[...] * inv                       # (1, ct, 1)
    bias = beta_ref[...] - mean * scale                # (1, ct, 1)

    # Re-read x from VMEM for the epilogue (mem-bound kernel; keeps vreg
    # pressure low across the reductions above).
    o_ref[...] = x_ref[...] * scale + bias + skip_ref[...]


def _pick_channel_tile(C):
    """Single grid step on 1-TC chips (v5e/v6e); small parallel grid on v7x."""
    try:
        kind = jax.devices()[0].device_kind.lower()
    except Exception:
        kind = ""
    if "v7" in kind and C % 8 == 0 and C > 8:
        return 8          # parallel channel blocks -> both TensorCores busy
    return C              # one block, one grid step


def batchnorm_add(x76_nchw, x68_nchw, gamma, beta):
    """x76_nchw, x68_nchw: (N, C, H, W) float32; gamma, beta: (C,) float32."""
    N, C, H, W = x76_nchw.shape
    L = H * W

    # Contiguous (metadata-only) reshapes — no HBM pad / transpose / slice.
    x = x76_nchw.reshape(N, C, L)
    skip = x68_nchw.reshape(N, C, L)
    g = gamma.reshape(1, C, 1)
    b = beta.reshape(1, C, 1)

    c_tile = _pick_channel_tile(C)
    grid = (C // c_tile,)
    inv_count = 1.0 / float(N * L)

    out = pl.pallas_call(
        functools.partial(bn_add_kernel, inv_count=inv_count),
        out_shape=jax.ShapeDtypeStruct((N, C, L), x.dtype),
        grid=grid,
        in_specs=[
            pl.BlockSpec((N, c_tile, L), lambda i: (0, i, 0)),
            pl.BlockSpec((N, c_tile, L), lambda i: (0, i, 0)),
            pl.BlockSpec((1, c_tile, 1), lambda i: (0, i, 0)),
            pl.BlockSpec((1, c_tile, 1), lambda i: (0, i, 0)),
        ],
        out_specs=pl.BlockSpec((N, c_tile, L), lambda i: (0, i, 0)),
        compiler_params=pltpu.CompilerParams(
            dimension_semantics=("parallel",)
        ),
    )(x, skip, g, b)

    # Metadata-only reshape back to NCHW.
    return out.reshape(N, C, H, W)


def reference(x76, x68, gamma, beta):
    mean = jnp.mean(x76, axis=(0, 2, 3), keepdims=True)
    var = jnp.mean((x76 - mean) ** 2, axis=(0, 2, 3), keepdims=True)
    xhat = (x76 - mean) / jnp.sqrt(var + EPS)
    return xhat * gamma.reshape(1, -1, 1, 1) + beta.reshape(1, -1, 1, 1) + x68


if __name__ == "__main__":
    key = jax.random.PRNGKey(0)
    k1, k2, k3, k4 = jax.random.split(key, 4)

    N, C, H, W = 1, 40, 28, 28
    x76 = jax.random.normal(k1, (N, C, H, W), dtype=jnp.float32)
    x68 = jax.random.normal(k2, (N, C, H, W), dtype=jnp.float32)
    # exercise the affine path with non-trivial params
    gamma = jax.random.normal(k3, (C,), dtype=jnp.float32) * 0.1 + 1.0
    beta = jax.random.normal(k4, (C,), dtype=jnp.float32) * 0.1

    out = batchnorm_add(x76, x68, gamma, beta)
    out = jax.block_until_ready(out)

    ref = reference(x76, x68, gamma, beta)
    assert out.shape == (N, C, H, W)
    assert jnp.allclose(out, ref, atol=1e-4, rtol=1e-4), float(
        jnp.max(jnp.abs(out - ref))
    )
    print("KERNEL_OK")
</pallas_src>

<mosaic_0001>
module attributes {stable_mosaic.version = 11 : i64} {
  func.func @bn_add_kernel(%arg0: i32, %arg1: memref<1x40x784xf32, #tpu.memory_space<vmem>>, %arg2: memref<1x40x784xf32, #tpu.memory_space<vmem>>, %arg3: memref<1x40x1xf32, #tpu.memory_space<vmem>>, %arg4: memref<1x40x1xf32, #tpu.memory_space<vmem>>, %arg5: memref<1x40x784xf32, #tpu.memory_space<vmem>>) attributes {dimension_semantics = [#tpu.dimension_semantics<parallel>], iteration_bounds = array<i64: 1>, scalar_prefetch = 0 : i64, scratch_operands = 0 : i64, tpu.core_type = #tpu.core_type<tc>, window_params = [{transform_indices = @transform_0, window_bounds = array<i64: 1, 40, 784>}, {transform_indices = @transform_1, window_bounds = array<i64: 1, 40, 784>}, {transform_indices = @transform_2, window_bounds = array<i64: 1, 40, 1>}, {transform_indices = @transform_3, window_bounds = array<i64: 1, 40, 1>}, {transform_indices = @transform_4, window_bounds = array<i64: 1, 40, 784>}]} {
    %c0 = arith.constant 0 : index
    %c0_0 = arith.constant 0 : index
    %c0_1 = arith.constant 0 : index
    %0 = vector.load %arg1[%c0, %c0_0, %c0_1] : memref<1x40x784xf32, #tpu.memory_space<vmem>>, vector<1x40x784xf32>
    %cst = arith.constant dense<0.000000e+00> : vector<40xf32>
    %1 = vector.multi_reduction <add>, %0, %cst [0, 2] : vector<1x40x784xf32> to vector<40xf32>
    %2 = vector.shape_cast %1 : vector<40xf32> to vector<1x40x1xf32>
    %3 = arith.mulf %0, %0 : vector<1x40x784xf32>
    %cst_2 = arith.constant dense<0.000000e+00> : vector<40xf32>
    %4 = vector.multi_reduction <add>, %3, %cst_2 [0, 2] : vector<1x40x784xf32> to vector<40xf32>
    %5 = vector.shape_cast %4 : vector<40xf32> to vector<1x40x1xf32>
    %cst_3 = arith.constant 0.00127551018 : f32
    %6 = vector.broadcast %cst_3 : f32 to vector<1x40x1xf32>
    %7 = arith.mulf %2, %6 : vector<1x40x1xf32>
    %cst_4 = arith.constant 0.00127551018 : f32
    %8 = vector.broadcast %cst_4 : f32 to vector<1x40x1xf32>
    %9 = arith.mulf %5, %8 : vector<1x40x1xf32>
    %10 = arith.mulf %7, %7 : vector<1x40x1xf32>
    %11 = arith.subf %9, %10 : vector<1x40x1xf32>
    %cst_5 = arith.constant 9.99999974E-6 : f32
    %12 = vector.broadcast %cst_5 : f32 to vector<1x40x1xf32>
    %13 = arith.addf %11, %12 : vector<1x40x1xf32>
    %14 = math.rsqrt %13 : vector<1x40x1xf32>
    %c0_6 = arith.constant 0 : index
    %c0_7 = arith.constant 0 : index
    %c0_8 = arith.constant 0 : index
    %15 = vector.load %arg3[%c0_6, %c0_7, %c0_8] : memref<1x40x1xf32, #tpu.memory_space<vmem>>, vector<1x40x1xf32>
    %16 = arith.mulf %15, %14 : vector<1x40x1xf32>
    %c0_9 = arith.constant 0 : index
    %c0_10 = arith.constant 0 : index
    %c0_11 = arith.constant 0 : index
    %17 = vector.load %arg4[%c0_9, %c0_10, %c0_11] : memref<1x40x1xf32, #tpu.memory_space<vmem>>, vector<1x40x1xf32>
    %18 = arith.mulf %7, %16 : vector<1x40x1xf32>
    %19 = arith.subf %17, %18 : vector<1x40x1xf32>
    %c0_12 = arith.constant 0 : index
    %c0_13 = arith.constant 0 : index
    %c0_14 = arith.constant 0 : index
    %20 = vector.load %arg1[%c0_12, %c0_13, %c0_14] : memref<1x40x784xf32, #tpu.memory_space<vmem>>, vector<1x40x784xf32>
    %21 = vector.broadcast %16 : vector<1x40x1xf32> to vector<1x40x784xf32>
    %22 = arith.mulf %20, %21 : vector<1x40x784xf32>
    %23 = vector.broadcast %19 : vector<1x40x1xf32> to vector<1x40x784xf32>
    %24 = arith.addf %22, %23 : vector<1x40x784xf32>
    %c0_15 = arith.constant 0 : index
    %c0_16 = arith.constant 0 : index
    %c0_17 = arith.constant 0 : index
    %25 = vector.load %arg2[%c0_15, %c0_16, %c0_17] : memref<1x40x784xf32, #tpu.memory_space<vmem>>, vector<1x40x784xf32>
    %26 = arith.addf %24, %25 : vector<1x40x784xf32>
    %c0_18 = arith.constant 0 : index
    %c0_19 = arith.constant 0 : index
    %c0_20 = arith.constant 0 : index
    %27 = vector.load %arg5[%c0_18, %c0_19, %c0_20] : memref<1x40x784xf32, #tpu.memory_space<vmem>>, vector<1x40x784xf32>
    tpu.vector_store %arg5[%c0_18, %c0_19, %c0_20], %26 {strides = array<i32>} : memref<1x40x784xf32, #tpu.memory_space<vmem>>, vector<1x40x784xf32>,
    return
  }
  func.func @transform_0(%arg0: i32) -> (i32, i32, i32) {
    %c0_i32 = arith.constant 0 : i32
    %c0_i32_0 = arith.constant 0 : i32
    %c0_i32_1 = arith.constant 0 : i32
    return %c0_i32, %arg0, %c0_i32_0 : i32, i32, i32
  }
  func.func @transform_1(%arg0: i32) -> (i32, i32, i32) {
    %c0_i32 = arith.constant 0 : i32
    %c0_i32_0 = arith.constant 0 : i32
    %c0_i32_1 = arith.constant 0 : i32
    return %c0_i32, %arg0, %c0_i32_0 : i32, i32, i32
  }
  func.func @transform_2(%arg0: i32) -> (i32, i32, i32) {
    %c0_i32 = arith.constant 0 : i32
    %c0_i32_0 = arith.constant 0 : i32
    %c0_i32_1 = arith.constant 0 : i32
    return %c0_i32, %arg0, %c0_i32_0 : i32, i32, i32
  }
  func.func @transform_3(%arg0: i32) -> (i32, i32, i32) {
    %c0_i32 = arith.constant 0 : i32
    %c0_i32_0 = arith.constant 0 : i32
    %c0_i32_1 = arith.constant 0 : i32
    return %c0_i32, %arg0, %c0_i32_0 : i32, i32, i32
  }
  func.func @transform_4(%arg0: i32) -> (i32, i32, i32) {
    %c0_i32 = arith.constant 0 : i32
    %c0_i32_0 = arith.constant 0 : i32
    %c0_i32_1 = arith.constant 0 : i32
    return %c0_i32, %arg0, %c0_i32_0 : i32, i32, i32
  }
}

</mosaic_0001>

<bundles_post_ra>
// kernel: tpu_custom_call.1
= control target key start
LH: loop header
LB: loop body
LE: loop exit
PB: predicated region body
PF: predicated region fallthrough
CT: control target
= control target key end

     0   :  { %9 = vsyncpa [#allocation3], 0  ;;  %s1013_s0 = inlined_call_operand.hbm [shape: f32[1,40,784], index: 0, kind: input, shape index: {}]   ;;  %s1014_s1 = inlined_call_operand.hbm [shape: f32[1,40,784], index: 1, kind: input, shape index: {}]   ;;  %s1015_s2 = inlined_call_operand.vmem [shape: f32[1,40,1], index: 2, kind: input, shape index: {}]   ;;  %s1016_s3 = inlined_call_operand.vmem [shape: f32[1,40,1], index: 3, kind: input, shape index: {}]   ;;  %s1017_s4 = inlined_call_operand.hbm [shape: f32[1,40,784], index: 4, kind: output, shape index: {}]  }
   0x1   :  { %10 = vsyncpa [#allocation6], 0 }
   0x2   :  { %11 = vsyncpa [#allocation4], 0  ;;  %s595_s15 = smov [#allocation2]   ;;  %s523_s19 = scalar_lea.hbm %s1013_s0, 4480 }
   0x3   :  { %s17_s16 = sshll.u32 %s595_s15, 4  ;;  %p524_p0 = scmp.ne.s32.totalorder %s1013_s0, %s523_s19  ;;  %s18_s16 = int_to_ptr.vmem [resolvable:$true] %s17_s16 }
   0x4   :  { %p527_p1 = scmp.lt.u32.totalorder %s523_s19, %s1013_s0 }
   0x6   :  { %p529_p2 = pnand %p527_p1, %p524_p0 }
   0x8   :  { %532 = shalt.err (!%p529_p2)
}
   0x9   :  { %s533_s24 = scalar_lea.vmem %s18_s16, 4480  ;;  %p538_p4 = scmp.lt.s32.totalorder %s18_s16, %s18_s16 }
   0xa   :  { %p534_p3 = scmp.ne.s32.totalorder %s18_s16, %s533_s24  ;;  %p539_p5 = scmp.lt.s32.totalorder %s533_s24, %s533_s24 }
   0xc   :  { %p540_p6 = por %p539_p5, %p538_p4 }
   0xe   :  { %p541_p7 = pnand %p540_p6, %p534_p3 }
  0x10   :  { %544 = shalt.err (!%p541_p7)
}
  0x11   :  { %s596_s25 = smov 896   ;;  %s597_s26 = smov 56  }
  0x12   :  { %23 = dma.hbm_to_vmem [thread:$0]  %s1013_s0, 4480, %s18_s16, [#allocation3], %s596_s25, %s596_s25, %s597_s26  }
  0x13   :  { %s598_s29 = smov [#allocation5]   ;;  %s545_s7 = scalar_lea.hbm %s1014_s1, 4480 }
  0x14   :  { %s29_s30 = sshll.u32 %s598_s29, 4  ;;  %p546_p8 = scmp.ne.s32.totalorder %s1014_s1, %s545_s7  ;;  %s30_s30 = int_to_ptr.vmem [resolvable:$true] %s29_s30 }
  0x15   :  { %p549_p9 = scmp.lt.u32.totalorder %s545_s7, %s1014_s1 }
  0x17   :  { %p551_p10 = pnand %p549_p9, %p546_p8 }
  0x19   :  { %554 = shalt.err (!%p551_p10)
}
  0x1a   :  { %s555_s12 = scalar_lea.vmem %s30_s30, 4480  ;;  %p560_p12 = scmp.lt.s32.totalorder %s30_s30, %s30_s30 }
  0x1b   :  { %p556_p11 = scmp.ne.s32.totalorder %s30_s30, %s555_s12  ;;  %p561_p13 = scmp.lt.s32.totalorder %s555_s12, %s555_s12 }
  0x1d   :  { %p562_p0 = por %p561_p13, %p560_p12 }
  0x1f   :  { %p563_p1 = pnand %p562_p0, %p556_p11 }
  0x21   :  { %566 = shalt.err (!%p563_p1)
}
  0x22   :  { %35 = dma.hbm_to_vmem [thread:$0]  %s1014_s1, 4480, %s30_s30, [#allocation6], %s596_s25, %s596_s25, %s597_s26  }
  0x23   :  { %589 = dma.done.wait [#allocation3], 4480  }
  0x24   :  { %590 = vsyncadd [#allocation3], 4294962816 }
  0x25   :  { %591 = dma.done.wait [#allocation6], 4480  }
  0x26   :  { %592 = vsyncadd [#allocation6], 4294962816  ;;  %v656_v0 = vld [vmem:[#allocation2 + $0x70] sm:$0xff]  ;;  %v658_v1 = vld [vmem:[#allocation2 + $0x78] sm:$0xff]  ;;  %vm86_vm0 = vcmask 130048  }
  0x27   :  { %v660_v2 = vld [vmem:[#allocation2 + $0x80] sm:$0xff]  ;;  %v662_v3 = vld [vmem:[#allocation2 + $0x88] sm:$0xff]  ;;  %v100_v4 = vadd.f32 %v658_v1, %v656_v0  ;;  %v141_v8 = vmul.f32 %v656_v0, %v656_v0  ;;  %v142_v9 = vmul.f32 %v658_v1, %v658_v1  ;;  %v676_v10 = vld [vmem:[#allocation2 + $0x90] sm:$0xff] }
  0x28   :  { %v666_v5 = vld [vmem:[#allocation2 + $0xa0] sm:$0xff]  ;;  %v670_v7 = vld [vmem:[#allocation2 + $0x8] sm:$0xff]  ;;  %v678_v11 = vld [vmem:[#allocation2 + $0x98] sm:$0xff]  ;;  %v143_v16 = vmul.f32 %v660_v2, %v660_v2  ;;  %v144_v22 = vmul.f32 %v662_v3, %v662_v3  ;;  %v145_v23 = vmul.f32 %v676_v10, %v676_v10 }
  0x29   :  { %v668_v6 = vld [vmem:[#allocation2] sm:$0xff]  ;;  %v101_v12 = vadd.f32 %v100_v4, %v660_v2  ;;  %v681_v13 = vld [vmem:[#allocation2 + $0x10] sm:$0xff]  ;;  %v689_v17 = vld [vmem:[#allocation2 + $0x18] sm:$0xff]  ;;  %v128_v20 = vmul.f32 %v670_v7, %v670_v7  ;;  %v105_v25 = vsel %vm86_vm0, %v666_v5, 0.0  ;;  %v715_v30 = vmul.f32 %v678_v11, %v678_v11 }
  0x2a   :  { %v81_v14 = vadd.f32 %v670_v7, %v668_v6  ;;  %v127_v15 = vmul.f32 %v668_v6, %v668_v6  ;;  %v691_v18 = vld [vmem:[#allocation2 + $0x30] sm:$0xff]  ;;  %v693_v19 = vld [vmem:[#allocation2 + $0xa8] sm:$0xff]  ;;  %v129_v21 = vmul.f32 %v681_v13, %v681_v13  ;;  %v706_v26 = vld [vmem:[#allocation2 + $0x20] sm:$0xff]  ;;  %v130_v34 = vmul.f32 %v689_v17, %v689_v17 }
  0x2b   :  { %v102_v24 = vadd.f32 %v101_v12, %v662_v3  ;;  %v709_v28 = vld [vmem:[#allocation2 + $0xb0] sm:$0xff]  ;;  %v711_v29 = vld [vmem:[#allocation2 + $0xb8] sm:$0xff]  ;;  %v717_v31 = vld [vmem:[#allocation2 + $0xc0] sm:$0xff]  ;;  %v131_v35 = vmul.f32 %v706_v26, %v706_v26  ;;  %v87_v39 = vsel %vm86_vm0, %v691_v18, 0.0  ;;  %v180_v43 = vadd.f32 %v142_v9, %v141_v8 }
  0x2c   :  { %v82_v27 = vadd.f32 %v81_v14, %v681_v13  ;;  %v719_v32 = vld [vmem:[#allocation2 + $0xd8] sm:$0xff]  ;;  %v109_v33 = vadd.f32 %v709_v28, %v693_v19  ;;  %v162_v36 = vadd.f32 %v128_v20, %v127_v15  ;;  %v733_v41 = vld [vmem:[#allocation2 + $0x40] sm:$0xff]  ;;  %v735_v42 = vld [vmem:[#allocation2 + $0x48] sm:$0xff]  ;;  %v133_v48 = vmul.f32 %v691_v18, %v691_v18 }
  0x2d   :  { %v103_v37 = vadd.f32 %v102_v24, %v676_v10  ;;  %v731_v40 = vld [vmem:[#allocation2 + $0x38] sm:$0xff]  ;;  %v737_v44 = vld [vmem:[#allocation2 + $0x28] sm:$0xff]  ;;  %v748_v52 = vld [vmem:[#allocation2 + $0x50] sm:$0xff]  ;;  %v181_v56 = vadd.f32 %v180_v43, %v143_v16  ;;  %v114_v58 = vsel %vm86_vm0, %v719_v32, 0.0 }
  0x2e   :  { %v83_v38 = vadd.f32 %v82_v27, %v689_v17  ;;  %v739_v45 = vld [vmem:[#allocation2 + $0xc8] sm:$0xff]  ;;  %v110_v46 = vadd.f32 %v109_v33, %v711_v29  ;;  %v91_v47 = vadd.f32 %v733_v41, %v731_v40  ;;  %v163_v49 = vadd.f32 %v162_v36, %v129_v21  ;;  %v752_v54 = vld [vmem:[#allocation2 + $0xe0] sm:$0xff]  ;;  %v760_v61 = vld [vmem:[#allocation2 + $0xf0] sm:$0xff] }
  0x2f   :  { %v104_v50 = vadd.f32 %v103_v37, %v678_v11  ;;  %v132_v53 = vmul.f32 %v737_v44, %v737_v44  ;;  %v754_v55 = vld [vmem:[#allocation2 + $0xe8] sm:$0xff]  ;;  %v763_v4 = vld [vmem:[#allocation2 + $0xd0] sm:$0xff]  ;;  %v765_v8 = vld [vmem:[#allocation2 + $0x58] sm:$0xff]  ;;  %v182_v12 = vadd.f32 %v181_v56, %v144_v22  ;;  %v167_v21 = vsel %vm86_vm0, %v133_v48, 0.0 }
  0x30   :  { %v84_v51 = vadd.f32 %v83_v38, %v706_v26  ;;  %v111_v57 = vadd.f32 %v110_v46, %v717_v31  ;;  %v92_v59 = vadd.f32 %v91_v47, %v735_v42  ;;  %v164_v60 = vadd.f32 %v163_v49, %v130_v34  ;;  %v770_v15 = vld [vmem:[#allocation2 + $0x68] sm:$0xff]  ;;  %v774_v24 = vld [vmem:[#allocation2 + $0xf8] sm:$0xff]  ;;  %v776_v27 = vld [vmem:[#allocation2 + $0x60] sm:$0xff] }
  0x31   :  { %v106_v62 = vadd.f32 %v105_v25, %v104_v50  ;;  %v118_v9 = vadd.f32 %v754_v55, %v752_v54  ;;  %v778_v33 = vld [vmem:[#allocation2 + $0x110] sm:$0xff]  ;;  %v183_v22 = vadd.f32 %v182_v12, %v145_v23  ;;  %v134_v36 = vmul.f32 %v731_v40, %v731_v40  ;;  %v785_v43 = vld [vmem:[#allocation2 + $0x100] sm:$0xff]  ;;  %v795_v50 = vld [vmem:[#allocation2 + $0x108] sm:$0xff] }
  0x32   :  { %v85_v63 = vadd.f32 %v84_v51, %v737_v44  ;;  %v112_v14 = vadd.f32 %v111_v57, %v739_v45  ;;  %v93_v16 = vadd.f32 %v92_v59, %v748_v52  ;;  %v165_v20 = vadd.f32 %v164_v60, %v131_v35 }
  0x33   :  { %107 = vadd.xlane.f32.xlu1 %v106_v62  ;;  %v119_v34 = vadd.f32 %v118_v9, %v760_v61  ;;  %v96_v46 = vsel %vm86_vm0, %v770_v15, 0.0  ;;  %v147_v23 = vmul.f32 %v666_v5, %v666_v5  ;;  %v123_v51 = vsel %vm86_vm0, %v778_v33, 0.0 }
  0x34   :  { %v88_v25 = vadd.f32 %v87_v39, %v85_v63  ;;  %v113_v37 = vadd.f32 %v112_v14, %v763_v4  ;;  %v94_v35 = vadd.f32 %v93_v16, %v765_v8  ;;  %v166_v38 = vadd.f32 %v165_v20, %v132_v53 }
  0x35   :  { %v135_v39 = vmul.f32 %v733_v41, %v733_v41  ;;  %v120_v47 = vadd.f32 %v119_v34, %v774_v24  ;;  %v136_v53 = vmul.f32 %v735_v42, %v735_v42  ;;  %v184_v59 = vadd.f32 %v183_v22, %v715_v30 }
  0x36   :  { %89 = vadd.xlane.f32.xlu0 %v88_v25  ;;  %v115_v48 = vadd.f32 %v114_v58, %v113_v37  ;;  %v95_v49 = vadd.f32 %v94_v35, %v776_v27  ;;  %v168_v56 = vadd.f32 %v167_v21, %v166_v38  ;;  %v137_v60 = vmul.f32 %v748_v52, %v748_v52 }
  0x37   :  { %v121_v57 = vadd.f32 %v120_v47, %v785_v43  ;;  %v171_v62 = vadd.f32 %v135_v39, %v134_v36  ;;  %v155_v63 = vmul.f32 %v752_v54, %v752_v54  ;;  %v156_v9 = vmul.f32 %v754_v55, %v754_v55 }
  0x38   :  { %116 = vadd.xlane.f32.xlu1 %v115_v48  ;;  %v97_v58 = vadd.f32 %v96_v46, %v95_v49  ;;  %v185_v14 = vsel %vm86_vm0, %v147_v23, 0.0  ;;  %v157_v16 = vmul.f32 %v760_v61, %v760_v61  ;;  %v138_v30 = vmul.f32 %v765_v8, %v765_v8 }
  0x39   :  { %v122_v12 = vadd.f32 %v121_v57, %v795_v50  ;;  %v140_v20 = vmul.f32 %v770_v15, %v770_v15  ;;  %v172_v21 = vadd.f32 %v171_v62, %v136_v53  ;;  %v158_v25 = vmul.f32 %v774_v24, %v774_v24 }
  0x3a   :  { %98 = vadd.xlane.f32.xlu0 %v97_v58  ;;  %v198_v22 = vadd.f32 %v156_v9, %v155_v63  ;;  %v148_v36 = vmul.f32 %v693_v19, %v693_v19  ;;  %v149_v37 = vmul.f32 %v709_v28, %v709_v28  ;;  %v186_v35 = vadd.f32 %v185_v14, %v184_v59 }
  0x3b   :  { %v124_v34 = vadd.f32 %v123_v51, %v122_v12  ;;  %v139_v38 = vmul.f32 %v776_v27, %v776_v27  ;;  %v173_v39 = vadd.f32 %v172_v21, %v137_v60  ;;  %v150_v46 = vmul.f32 %v711_v29, %v711_v29 }
  0x3c   :  { %169 = vadd.xlane.f32.xlu1 %v168_v56  ;;  %v159_v47 = vmul.f32 %v785_v43, %v785_v43  ;;  %v199_v23 = vadd.f32 %v198_v22, %v157_v16  ;;  %v161_v49 = vmul.f32 %v778_v33, %v778_v33  ;;  %v151_v51 = vmul.f32 %v717_v31, %v717_v31 }
  0x3d   :  { %v174_v48 = vadd.f32 %v173_v39, %v138_v30  ;;  %v189_v53 = vadd.f32 %v149_v37, %v148_v36  ;;  %v176_v56 = vsel %vm86_vm0, %v140_v20, 0.0  ;;  %v160_v57 = vmul.f32 %v795_v50, %v795_v50 }
  0x3e   :  { %125 = vadd.xlane.f32.xlu0 %v124_v34  ;;  %v200_v59 = vadd.f32 %v199_v23, %v158_v25  ;;  %v152_v58 = vmul.f32 %v739_v45, %v739_v45  ;;  %v154_v9 = vmul.f32 %v719_v32, %v719_v32  ;;  %v203_v14 = vsel %vm86_vm0, %v161_v49, 0.0 }
  0x3f   :  { %v175_v60 = vadd.f32 %v174_v48, %v139_v38  ;;  %v190_v62 = vadd.f32 %v189_v53, %v150_v46  ;;  %v153_v16 = vmul.f32 %v763_v4, %v763_v4  ;;  %v599_v37 = vmov 0  }
  0x40   :  { %187 = vadd.xlane.f32.xlu1 %v186_v35  ;;  %v201_v63 = vadd.f32 %v200_v59, %v159_v47  ;;  %v194_v34 = vsel %vm86_vm0, %v154_v9, 0.0  ;;  %511 = vset.pattern.permute.xlu0 %v599_v37 }
  0x41   :  { %v177_v12 = vadd.f32 %v176_v56, %v175_v60  ;;  %v191_v30 = vadd.f32 %v190_v62, %v151_v51  ;;  %512 = vset.pattern.permute.xlu1 %v599_v37 }
  0x42   :  { %v202_v20 = vadd.f32 %v201_v63, %v160_v57 }
  0x43   :  { %178 = vadd.xlane.f32.xlu0 %v177_v12  ;;  %v192_v21 = vadd.f32 %v191_v30, %v152_v58 }
  0x44   :  { %v204_v25 = vadd.f32 %v203_v14, %v202_v20 }
  0x45   :  { %v193_v22 = vadd.f32 %v192_v21, %v153_v16 }
  0x46   :  { %205 = vadd.xlane.f32.xlu1 %v204_v25 }
  0x47   :  { %v195_v36 = vadd.f32 %v194_v34, %v193_v22 }
  0x49   :  { %196 = vadd.xlane.f32.xlu0 %v195_v36 }
  0xc0   :  { %v108_v35 = vpop.xlane.xlu1 %107 }
  0xc1   :  { %v209_v53 = vmul.f32 0.0012755102, %v108_v35 }
  0xc3   :  { %v90_v38 = vpop.xlane.xlu0 %89  ;;  %v219_v62 = vmul.f32 %v209_v53, %v209_v53 }
  0xc4   :  { %v207_v46 = vmul.f32 0.0012755102, %v90_v38 }
  0xc5   :  { %v117_v39 = vpop.xlane.xlu1 %116 }
  0xc6   :  { %v217_v48 = vmul.f32 %v207_v46, %v207_v46  ;;  %v210_v30 = vmul.f32 0.0012755102, %v117_v39 }
  0xc7   :  { %v99_v47 = vpop.xlane.xlu0 %98 }
  0xc8   :  { %v208_v59 = vmul.f32 0.0012755102, %v99_v47  ;;  %v220_v38 = vmul.f32 %v210_v30, %v210_v30 }
  0xc9   :  { %v170_v23 = vpop.xlane.xlu1 %169 }
  0xca   :  { %v212_v49 = vmul.f32 0.0012755102, %v170_v23  ;;  %v218_v12 = vmul.f32 %v208_v59, %v208_v59  ;;  %v237_v23 = vld [vmem:[%s1015_s2] sm:$0xff] }
  0xcb   :  { %v126_v51 = vpop.xlane.xlu0 %125 }
  0xcc   :  { %v222_v56 = vsub.f32 %v212_v49, %v217_v48  ;;  %v211_v63 = vmul.f32 0.0012755102, %v126_v51 }
  0xcd   :  { %v188_v57 = vpop.xlane.xlu1 %187 }
  0xce   :  { %v227_v60 = vadd.f32 1e-05, %v222_v56  ;;  %v214_v58 = vmul.f32 0.0012755102, %v188_v57  ;;  %v221_v25 = vmul.f32 %v211_v63, %v211_v63  ;;  %v238_v57 = vld [vmem:[%s1015_s2 + $0x8] sm:$0xff] }
  0xd0   :  { %513 = vrsqrt.f32 %v227_v60  ;;  %v179_v9 = vpop.xlane.xlu0 %178  ;;  %v224_v14 = vsub.f32 %v214_v58, %v219_v62  ;;  %v241_v62 = vld [vmem:[%s1015_s2 + $0x20] sm:$0xff] }
  0xd1   :  { %v213_v16 = vmul.f32 0.0012755102, %v179_v9 }
  0xd2   :  { %v229_v22 = vadd.f32 1e-05, %v224_v14 }
  0xd3   :  { %v223_v20 = vsub.f32 %v213_v16, %v218_v12  ;;  %v206_v21 = vpop.xlane.xlu1 %205  ;;  %v239_v12 = vld [vmem:[%s1015_s2 + $0x10] sm:$0xff] }
  0xd4   :  { %v216_v34 = vmul.f32 0.0012755102, %v206_v21  ;;  %v251_v21 = vld [vmem:[%s1016_s3 + $0x20] sm:$0xff] }
  0xd5   :  { %v228_v36 = vadd.f32 1e-05, %v223_v20 }
  0xd6   :  { %v226_v37 = vsub.f32 %v216_v34, %v221_v25  ;;  %v197_v35 = vpop.xlane.xlu0 %196 }
  0xd7   :  { %515 = vrsqrt.f32 %v228_v36  ;;  %v215_v47 = vmul.f32 0.0012755102, %v197_v35 }
  0xd8   :  { %v231_v48 = vadd.f32 1e-05, %v226_v37  ;;  %517 = vrsqrt.f32 %v229_v22  ;;  %v240_v22 = vld [vmem:[%s1015_s2 + $0x18] sm:$0xff] }
  0xd9   :  { %v225_v51 = vsub.f32 %v215_v47, %v220_v38  ;;  %v247_v38 = vld [vmem:[%s1016_s3] sm:$0xff] }
  0xda   :  { %v514_v49 = vpop.eup %513  ;;  %519 = vrsqrt.f32 %v231_v48 }
  0xdb   :  { %v242_v39 = vmul.f32 %v514_v49, %v237_v23  ;;  %v230_v56 = vadd.f32 1e-05, %v225_v51  ;;  %v249_v51 = vld [vmem:[%s1016_s3 + $0x10] sm:$0xff] }
  0xdd   :  { %264 = vperm.xlu0 %511, %v242_v39   ;;  %521 = vrsqrt.f32 %v230_v56  ;;  %v252_v35 = vmul.f32 %v242_v39, %v207_v46  ;;  %v250_v56 = vld [vmem:[%s1016_s3 + $0x18] sm:$0xff] }
  0xdf   :  { %v257_v47 = vsub.f32 %v247_v38, %v252_v35  ;;  %v416_v38 = vld [vmem:[#allocation5 + $0x110] sm:$0xff] }
  0xe1   :  { %v516_v60 = vpop.eup %515 }
  0xe2   :  { %v243_v58 = vmul.f32 %v516_v60, %v238_v57  ;;  %v518_v9 = vpop.eup %517 }
  0xe3   :  { %v244_v20 = vmul.f32 %v518_v9, %v239_v12 }
  0xe4   :  { %v520_v14 = vpop.eup %519  ;;  %269 = vperm.xlu1 %512, %v243_v58   ;;  %v253_v23 = vmul.f32 %v243_v58, %v208_v59 }
  0xe5   :  { %v246_v16 = vmul.f32 %v520_v14, %v241_v62  ;;  %v254_v49 = vmul.f32 %v244_v20, %v209_v53 }
  0xe7   :  { %v522_v25 = vpop.eup %521  ;;  %v256_v34 = vmul.f32 %v246_v16, %v211_v63  ;;  %v248_v63 = vld [vmem:[%s1016_s3 + $0x8] sm:$0xff]  ;;  %v259_v46 = vsub.f32 %v249_v51, %v254_v49  ;;  %s600_s3 = smov [#allocation7]  }
  0xe8   :  { %274 = vperm.xlu1 %512, %v244_v20   ;;  %v245_v37 = vmul.f32 %v522_v25, %v240_v22  ;;  %v258_v48 = vsub.f32 %v248_v63, %v253_v23  ;;  %v412_v22 = vld [vmem:[#allocation5 + $0xf0] sm:$0xff]  ;;  %s492_s8 = sshll.u32 %s600_s3, 4  ;;  %s493_s8 = int_to_ptr.vmem [resolvable:$true] %s492_s8 }
  0xe9   :  { %v261_v36 = vsub.f32 %v251_v21, %v256_v34  ;;  %v411_v34 = vld [vmem:[#allocation5 + $0xe8] sm:$0xff]  ;;  %s567_s9 = scalar_lea.vmem %s493_s8, 4480  ;;  %p572_p3 = scmp.lt.s32.totalorder %s493_s8, %s493_s8 }
  0xea   :  { %v255_v39 = vmul.f32 %v245_v37, %v210_v30  ;;  %p568_p2 = scmp.ne.s32.totalorder %s493_s8, %s567_s9  ;;  %p573_p4 = scmp.lt.s32.totalorder %s567_s9, %s567_s9 }
  0xeb   :  { %344 = vperm.xlu0 %511, %v261_v36   ;;  %v413_v36 = vld [vmem:[#allocation5 + $0xf8] sm:$0xff] }
  0xec   :  { %279 = vperm.xlu1 %512, %v245_v37   ;;  %v260_v59 = vsub.f32 %v250_v56, %v255_v39  ;;  %v382_v39 = vld [vmem:[#allocation5] sm:$0xff]  ;;  %v383_v56 = vld [vmem:[#allocation5 + $0x8] sm:$0xff]  ;;  %p574_p5 = por %p573_p4, %p572_p3 }
  0xee   :  { %p575_p6 = pnand %p574_p5, %p568_p2 }
  0xf0   :  { %284 = vperm.xlu1 %512, %v246_v16  }
  0xf4   :  { %324 = vperm.xlu1 %512, %v257_v47  }
  0xf8   :  { %329 = vperm.xlu1 %512, %v258_v48  }
  0xfc   :  { %334 = vperm.xlu1 %512, %v259_v46  }
 0x100   :  { %339 = vperm.xlu1 %512, %v260_v59  }
 0x15c   :  { %v265_v60 = vpop.permute.xlu0 %264 }
 0x15d   :  { %v287_v62 = vmul.f32 %v265_v60, %v668_v6  ;;  %v876_v53 = vmul.f32 %v265_v60, %v670_v7  ;;  %v879_v9 = vmul.f32 %v265_v60, %v681_v13  ;;  %v882_v30 = vmul.f32 %v265_v60, %v689_v17 }
 0x15e   :  { %v885_v12 = vmul.f32 %v265_v60, %v706_v26  ;;  %v888_v14 = vmul.f32 %v265_v60, %v737_v44  ;;  %v891_v16 = vmul.f32 %v265_v60, %v691_v18 }
 0x163   :  { %v270_v57 = vpop.permute.xlu1 %269 }
 0x164   :  { %v896_v6 = vmul.f32 %v270_v57, %v731_v40  ;;  %v899_v7 = vmul.f32 %v270_v57, %v733_v41  ;;  %v902_v13 = vmul.f32 %v270_v57, %v735_v42  ;;  %v905_v17 = vmul.f32 %v270_v57, %v748_v52 }
 0x165   :  { %v908_v26 = vmul.f32 %v270_v57, %v765_v8  ;;  %v911_v18 = vmul.f32 %v270_v57, %v776_v27  ;;  %v914_v44 = vmul.f32 %v270_v57, %v770_v15 }
 0x167   :  { %v275_v58 = vpop.permute.xlu1 %274 }
 0x168   :  { %v917_v40 = vmul.f32 %v275_v58, %v656_v0  ;;  %v920_v41 = vmul.f32 %v275_v58, %v658_v1  ;;  %v923_v42 = vmul.f32 %v275_v58, %v660_v2  ;;  %v926_v52 = vmul.f32 %v275_v58, %v662_v3  ;;  %v410_v3 = vld [vmem:[#allocation5 + $0xe0] sm:$0xff] }
 0x169   :  { %v929_v8 = vmul.f32 %v275_v58, %v676_v10  ;;  %v932_v27 = vmul.f32 %v275_v58, %v678_v11  ;;  %v935_v15 = vmul.f32 %v275_v58, %v666_v5  ;;  %v384_v58 = vld [vmem:[#allocation5 + $0x10] sm:$0xff] }
 0x16a   :  { %v345_v5 = vpop.permute.xlu0 %344 }
 0x16b   :  { %v893_v20 = vpop.permute.xlu1 %279 }
 0x16c   :  { %v939_v1 = vmul.f32 %v893_v20, %v693_v19  ;;  %v943_v2 = vmul.f32 %v893_v20, %v709_v28  ;;  %v954_v35 = vmul.f32 %v893_v20, %v711_v29 }
 0x16f   :  { %v285_v0 = vpop.permute.xlu1 %284 }
 0x170   :  { %v315_v21 = vmul.f32 %v285_v0, %v752_v54  ;;  %v316_v10 = vmul.f32 %v285_v0, %v754_v55  ;;  %v317_v11 = vmul.f32 %v285_v0, %v760_v61  ;;  %v318_v25 = vmul.f32 %v285_v0, %v774_v24  ;;  %v414_v54 = vld [vmem:[#allocation5 + $0x100] sm:$0xff]  ;;  %v415_v55 = vld [vmem:[#allocation5 + $0x108] sm:$0xff] }
 0x171   :  { %v319_v19 = vmul.f32 %v285_v0, %v785_v43  ;;  %v320_v37 = vmul.f32 %v285_v0, %v795_v50  ;;  %v321_v28 = vmul.f32 %v285_v0, %v778_v33  ;;  %v958_v43 = vmul.f32 %v893_v20, %v717_v31  ;;  %v385_v0 = vld [vmem:[#allocation5 + $0x18] sm:$0xff]  ;;  %v388_v31 = vld [vmem:[#allocation5 + $0x30] sm:$0xff] }
 0x172   :  { %v375_v61 = vadd.f32 %v345_v5, %v315_v21  ;;  %v376_v47 = vadd.f32 %v345_v5, %v316_v10  ;;  %v377_v24 = vadd.f32 %v345_v5, %v317_v11  ;;  %v378_v23 = vadd.f32 %v345_v5, %v318_v25  ;;  %v386_v21 = vld [vmem:[#allocation5 + $0x20] sm:$0xff]  ;;  %v387_v11 = vld [vmem:[#allocation5 + $0x28] sm:$0xff] }
 0x173   :  { %v379_v63 = vadd.f32 %v345_v5, %v319_v19  ;;  %v380_v48 = vadd.f32 %v345_v5, %v320_v37  ;;  %v381_v49 = vadd.f32 %v345_v5, %v321_v28  ;;  %v325_v51 = vpop.permute.xlu1 %324  ;;  %v969_v37 = vmul.f32 %v893_v20, %v739_v45  ;;  %v395_v45 = vld [vmem:[#allocation5 + $0x68] sm:$0xff] }
 0x174   :  { %v445_v33 = vadd.f32 %v410_v3, %v375_v61  ;;  %v446_v50 = vadd.f32 %v411_v34, %v376_v47  ;;  %v447_v46 = vadd.f32 %v412_v22, %v377_v24  ;;  %v448_v29 = vadd.f32 %v413_v36, %v378_v23  ;;  %v392_v47 = vld [vmem:[#allocation5 + $0x50] sm:$0xff]  ;;  %v394_v24 = vld [vmem:[#allocation5 + $0x60] sm:$0xff] }
 0x175   :  { %v449_v59 = vadd.f32 %v414_v54, %v379_v63  ;;  %v450_v57 = vadd.f32 %v415_v55, %v380_v48  ;;  %v451_v60 = vadd.f32 %v416_v38, %v381_v49  ;;  %v347_v10 = vadd.f32 %v325_v51, %v287_v62  ;;  %v389_v54 = vld [vmem:[#allocation5 + $0x38] sm:$0xff]  ;;  %v391_v55 = vld [vmem:[#allocation5 + $0x48] sm:$0xff] }
 0x176   :  { %480 = vst [vmem:[#allocation7 + $0xe0] sm:$0xff] %v445_v33  ;;  %481 = vst [vmem:[#allocation7 + $0xe8] sm:$0xff] %v446_v50  ;;  %v348_v3 = vadd.f32 %v325_v51, %v876_v53  ;;  %v349_v25 = vadd.f32 %v325_v51, %v879_v9  ;;  %v350_v5 = vadd.f32 %v325_v51, %v882_v30  ;;  %v396_v50 = vld [vmem:[#allocation5 + $0x70] sm:$0xff] }
 0x177   :  { %482 = vst [vmem:[#allocation7 + $0xf0] sm:$0xff] %v447_v46  ;;  %483 = vst [vmem:[#allocation7 + $0xf8] sm:$0xff] %v448_v29  ;;  %v351_v34 = vadd.f32 %v325_v51, %v885_v12  ;;  %v352_v62 = vadd.f32 %v325_v51, %v888_v14  ;;  %v353_v22 = vadd.f32 %v325_v51, %v891_v16  ;;  %v330_v19 = vpop.permute.xlu1 %329  ;;  %v390_v12 = vld [vmem:[#allocation5 + $0x40] sm:$0xff]  ;;  %v393_v14 = vld [vmem:[#allocation5 + $0x58] sm:$0xff] }
 0x178   :  { %484 = vst [vmem:[#allocation7 + $0x100] sm:$0xff] %v449_v59  ;;  %485 = vst [vmem:[#allocation7 + $0x108] sm:$0xff] %v450_v57  ;;  %v417_v36 = vadd.f32 %v382_v39, %v347_v10  ;;  %v418_v53 = vadd.f32 %v383_v56, %v348_v3  ;;  %v419_v9 = vadd.f32 %v384_v58, %v349_v25  ;;  %v397_v59 = vld [vmem:[#allocation5 + $0x78] sm:$0xff]  ;;  %v399_v57 = vld [vmem:[#allocation5 + $0x88] sm:$0xff] }
 0x179   :  { %486 = vst.msk [vmem:[#allocation7 + $0x110] sm:$0xff] %vm86_vm0, %v451_v60  ;;  %v420_v28 = vadd.f32 %v385_v0, %v350_v5  ;;  %v421_v30 = vadd.f32 %v386_v21, %v351_v34  ;;  %v422_v38 = vadd.f32 %v387_v11, %v352_v62  ;;  %v423_v61 = vadd.f32 %v388_v31, %v353_v22  ;;  %v400_v60 = vld [vmem:[#allocation5 + $0x90] sm:$0xff]  ;;  %v401_v58 = vld [vmem:[#allocation5 + $0x98] sm:$0xff] }
 0x17a   :  { %452 = vst [vmem:[#allocation7] sm:$0xff] %v417_v36  ;;  %v354_v16 = vadd.f32 %v330_v19, %v896_v6  ;;  %v355_v23 = vadd.f32 %v330_v19, %v899_v7  ;;  %453 = vst [vmem:[#allocation7 + $0x8] sm:$0xff] %v418_v53  ;;  %v356_v63 = vadd.f32 %v330_v19, %v902_v13  ;;  %v406_v53 = vld [vmem:[#allocation5 + $0xc0] sm:$0xff] }
 0x17b   :  { %454 = vst [vmem:[#allocation7 + $0x10] sm:$0xff] %v419_v9  ;;  %455 = vst [vmem:[#allocation7 + $0x18] sm:$0xff] %v420_v28  ;;  %v357_v48 = vadd.f32 %v330_v19, %v905_v17  ;;  %v358_v49 = vadd.f32 %v330_v19, %v908_v26  ;;  %v359_v51 = vadd.f32 %v330_v19, %v911_v18  ;;  %v335_v46 = vpop.permute.xlu1 %334  ;;  %v398_v26 = vld [vmem:[#allocation5 + $0x80] sm:$0xff]  ;;  %v409_v9 = vld [vmem:[#allocation5 + $0xd8] sm:$0xff] }
 0x17c   :  { %456 = vst [vmem:[#allocation7 + $0x20] sm:$0xff] %v421_v30  ;;  %457 = vst [vmem:[#allocation7 + $0x28] sm:$0xff] %v422_v38  ;;  %v360_v6 = vadd.f32 %v330_v19, %v914_v44  ;;  %v424_v33 = vadd.f32 %v389_v54, %v354_v16  ;;  %v425_v7 = vadd.f32 %v390_v12, %v355_v23  ;;  %v402_v44 = vld [vmem:[#allocation5 + $0xa0] sm:$0xff]  ;;  %v404_v19 = vld [vmem:[#allocation5 + $0xb0] sm:$0xff] }
 0x17d   :  { %458 = vst.msk [vmem:[#allocation7 + $0x30] sm:$0xff] %vm86_vm0, %v423_v61  ;;  %v313_v29 = vmul.f32 %v893_v20, %v763_v4  ;;  %v426_v39 = vadd.f32 %v391_v55, %v356_v63  ;;  %v427_v13 = vadd.f32 %v392_v47, %v357_v48  ;;  %v428_v56 = vadd.f32 %v393_v14, %v358_v49 }
 0x17e   :  { %v429_v17 = vadd.f32 %v394_v24, %v359_v51  ;;  %v430_v18 = vadd.f32 %v395_v45, %v360_v6  ;;  %459 = vst [vmem:[#allocation7 + $0x38] sm:$0xff] %v424_v33  ;;  %460 = vst [vmem:[#allocation7 + $0x40] sm:$0xff] %v425_v7  ;;  %v361_v0 = vadd.f32 %v335_v46, %v917_v40 }
 0x17f   :  { %v362_v21 = vadd.f32 %v335_v46, %v920_v41  ;;  %v363_v10 = vadd.f32 %v335_v46, %v923_v42  ;;  %461 = vst [vmem:[#allocation7 + $0x48] sm:$0xff] %v426_v39  ;;  %462 = vst [vmem:[#allocation7 + $0x50] sm:$0xff] %v427_v13  ;;  %v364_v4 = vadd.f32 %v335_v46, %v926_v52  ;;  %v403_v42 = vld [vmem:[#allocation5 + $0xa8] sm:$0xff]  ;;  %v340_v34 = vpop.permute.xlu1 %339 }
 0x180   :  { %463 = vst [vmem:[#allocation7 + $0x58] sm:$0xff] %v428_v56  ;;  %464 = vst [vmem:[#allocation7 + $0x60] sm:$0xff] %v429_v17  ;;  %v365_v11 = vadd.f32 %v335_v46, %v929_v8  ;;  %v366_v31 = vadd.f32 %v335_v46, %v932_v27  ;;  %v367_v3 = vadd.f32 %v335_v46, %v935_v15  ;;  %v405_v8 = vld [vmem:[#allocation5 + $0xb8] sm:$0xff]  ;;  %v407_v27 = vld [vmem:[#allocation5 + $0xc8] sm:$0xff] }
 0x181   :  { %465 = vst.msk [vmem:[#allocation7 + $0x68] sm:$0xff] %vm86_vm0, %v430_v18  ;;  %v431_v25 = vadd.f32 %v396_v50, %v361_v0  ;;  %v432_v40 = vadd.f32 %v397_v59, %v362_v21  ;;  %v433_v5 = vadd.f32 %v398_v26, %v363_v10  ;;  %v314_v41 = vmul.f32 %v893_v20, %v719_v32  ;;  %v408_v15 = vld [vmem:[#allocation5 + $0xd0] sm:$0xff] }
 0x182   :  { %v434_v62 = vadd.f32 %v399_v57, %v364_v4  ;;  %v435_v22 = vadd.f32 %v400_v60, %v365_v11  ;;  %v436_v36 = vadd.f32 %v401_v58, %v366_v31  ;;  %v437_v52 = vadd.f32 %v402_v44, %v367_v3 }
 0x183   :  { %466 = vst [vmem:[#allocation7 + $0x70] sm:$0xff] %v431_v25  ;;  %467 = vst [vmem:[#allocation7 + $0x78] sm:$0xff] %v432_v40  ;;  %v368_v28 = vadd.f32 %v340_v34, %v939_v1  ;;  %v369_v30 = vadd.f32 %v340_v34, %v943_v2  ;;  %v370_v32 = vadd.f32 %v340_v34, %v954_v35 }
 0x184   :  { %468 = vst [vmem:[#allocation7 + $0x80] sm:$0xff] %v433_v5  ;;  %v371_v20 = vadd.f32 %v340_v34, %v958_v43  ;;  %469 = vst [vmem:[#allocation7 + $0x88] sm:$0xff] %v434_v62  ;;  %v372_v54 = vadd.f32 %v340_v34, %v969_v37  ;;  %v373_v12 = vadd.f32 %v340_v34, %v313_v29 }
 0x185   :  { %470 = vst [vmem:[#allocation7 + $0x90] sm:$0xff] %v435_v22  ;;  %471 = vst [vmem:[#allocation7 + $0x98] sm:$0xff] %v436_v36  ;;  %v374_v55 = vadd.f32 %v340_v34, %v314_v41  ;;  %v438_v38 = vadd.f32 %v403_v42, %v368_v28  ;;  %v439_v61 = vadd.f32 %v404_v19, %v369_v30 }
 0x186   :  { %472 = vst.msk [vmem:[#allocation7 + $0xa0] sm:$0xff] %vm86_vm0, %v437_v52  ;;  %v440_v1 = vadd.f32 %v405_v8, %v370_v32  ;;  %v441_v47 = vadd.f32 %v406_v53, %v371_v20  ;;  %v442_v2 = vadd.f32 %v407_v27, %v372_v54  ;;  %v443_v14 = vadd.f32 %v408_v15, %v373_v12 }
 0x187   :  { %v444_v35 = vadd.f32 %v409_v9, %v374_v55  ;;  %473 = vst [vmem:[#allocation7 + $0xa8] sm:$0xff] %v438_v38  ;;  %474 = vst [vmem:[#allocation7 + $0xb0] sm:$0xff] %v439_v61 }
 0x188   :  { %475 = vst [vmem:[#allocation7 + $0xb8] sm:$0xff] %v440_v1  ;;  %476 = vst [vmem:[#allocation7 + $0xc0] sm:$0xff] %v441_v47 }
 0x189   :  { %477 = vst [vmem:[#allocation7 + $0xc8] sm:$0xff] %v442_v2  ;;  %478 = vst [vmem:[#allocation7 + $0xd0] sm:$0xff] %v443_v14 }
 0x18a   :  { %479 = vst.msk [vmem:[#allocation7 + $0xd8] sm:$0xff] %vm86_vm0, %v444_v35 }
 0x18b   :  { %578 = shalt.err (!%p575_p6)
}
 0x18c   :  { %s579_s12 = scalar_lea.hbm %s1017_s4, 4480 }
 0x18d   :  { %p580_p7 = scmp.ne.s32.totalorder %s1017_s4, %s579_s12  ;;  %p583_p8 = scmp.lt.u32.totalorder %s579_s12, %s1017_s4 }
 0x18f   :  { %p585_p9 = pnand %p583_p8, %p580_p7 }
 0x191   :  { %588 = shalt.err (!%p585_p9)
}
 0x192   :  { %498 = dma.vmem_to_hbm [thread:$0]  %s493_s8, 4480, %s1017_s4, [#allocation4], %s596_s25, %s596_s25, %s597_s26  }
 0x193   :  { %593 = dma.done.wait [#allocation4], 4480  }
 0x194   :  { %594 = vsyncadd [#allocation4], 4294962816 }
 0x195   :  { %502 = vsyncpa [#allocation3], 1 }
 0x196   :  { %503 = vsyncpa [#allocation6], 1 }
 0x197   :  { %504 = vsyncpa [#allocation4], 1 }

</bundles_post_ra>
